<compile_context>
chip_gen: v7x
topology: tpu7x:2x2x1
jax: 0.10.0
libtpu: 0.0.40
codegen_flags: <defaults>
</compile_context>

<pallas_src>
import jax
import jax.numpy as jnp
from jax.experimental import pallas as pl
from jax.experimental.pallas import tpu as pltpu

STATE_SIZE = 96
HIDDEN = 128
ACTION_SIZE = 3
PADDED_STATE = 128   # STATE_SIZE zero-padded to the 128-lane vreg width
HEAD_WIDTH = 128     # fused (pi ++ v) head padded to a lane-dense 128 columns


def _round_up(n, m):
    return ((n + m - 1) // m) * m


def actor_critic_kernel(x_ref, w1_ref, b1_ref, w2_ref, b2_ref, wh_ref, bh_ref, out_ref):
    # d1 + relu (MXU accumulates in f32 regardless of operand dtype; biases are f32)
    h1 = jnp.dot(x_ref[...], w1_ref[...], preferred_element_type=jnp.float32) + b1_ref[...]
    h1 = jnp.maximum(h1, 0.0).astype(x_ref.dtype)
    # d2 + relu
    h2 = jnp.dot(h1, w2_ref[...], preferred_element_type=jnp.float32) + b2_ref[...]
    h2 = jnp.maximum(h2, 0.0).astype(x_ref.dtype)
    # fused heads: lanes [0, ACTION_SIZE) are policy logits, lane ACTION_SIZE is the value
    head = jnp.dot(h2, wh_ref[...], preferred_element_type=jnp.float32) + bh_ref[...]
    lane = jax.lax.broadcasted_iota(jnp.int32, head.shape, dimension=1)
    is_pi = lane < ACTION_SIZE
    # masked softmax over the first ACTION_SIZE lanes only (padded lanes must not leak)
    logits = jnp.where(is_pi, head, -1e30)
    m = jnp.max(logits, axis=-1, keepdims=True)
    e = jnp.where(is_pi, jnp.exp(logits - m), 0.0)
    pi = e / jnp.sum(e, axis=-1, keepdims=True)
    # lane-dense store: pi in lanes 0..2, v in lane 3, zeros elsewhere
    out = jnp.where(is_pi, pi, jnp.where(lane == ACTION_SIZE, head, 0.0))
    out_ref[...] = out.astype(out_ref.dtype)


def prepare_params(raw_params, compute_dtype=jnp.float32):
    """Pad/fuse raw params for the kernel (done once, outside the hot path):
       - w1 [96,128] -> [128,128] with zero rows for the padded input features
       - pi/v heads fused into a lane-dense [128,128] weight (cols 0..2 = pi, col 3 = v)
       Weights cast to compute_dtype (bf16 recommended on v6e/v7x); biases stay f32."""
    w1, b1, w2, b2, wpi, bpi, wv, bv = raw_params
    w1p = jnp.zeros((PADDED_STATE, HIDDEN), jnp.float32).at[:STATE_SIZE, :].set(w1)
    wh = jnp.zeros((HIDDEN, HEAD_WIDTH), jnp.float32)
    wh = wh.at[:, :ACTION_SIZE].set(wpi).at[:, ACTION_SIZE:ACTION_SIZE + 1].set(wv)
    bh = jnp.zeros((1, HEAD_WIDTH), jnp.float32)
    bh = bh.at[:, :ACTION_SIZE].set(bpi).at[:, ACTION_SIZE:ACTION_SIZE + 1].set(bv)
    cd = compute_dtype
    return (w1p.astype(cd), b1.astype(jnp.float32),
            w2.astype(cd), b2.astype(jnp.float32),
            wh.astype(cd), bh.astype(jnp.float32))


def actor_critic_forward(x, prepared_params, *, block_rows=512):
    """x: [B, STATE_SIZE]. Returns (pi [B, ACTION_SIZE] f32, v [B, 1] f32)."""
    w1, b1, w2, b2, wh, bh = prepared_params
    compute_dtype = w1.dtype
    B = x.shape[0]
    tb = min(block_rows, _round_up(B, 16))   # >= 16 rows: sublane-aligned for f32 and bf16
    Bp = _round_up(B, tb)

    # Zero-pad features 96 -> 128 and batch B -> Bp (padded rows are sliced off below).
    xp = jnp.zeros((Bp, PADDED_STATE), compute_dtype)
    xp = xp.at[:B, :STATE_SIZE].set(x.astype(compute_dtype))

    const = lambda i: (0, 0)
    out = pl.pallas_call(
        actor_critic_kernel,
        out_shape=jax.ShapeDtypeStruct((Bp, HEAD_WIDTH), jnp.float32),
        grid=(Bp // tb,),
        in_specs=[
            pl.BlockSpec((tb, PADDED_STATE), lambda i: (i, 0)),     # x: streamed per batch tile
            pl.BlockSpec((PADDED_STATE, HIDDEN), const),            # w1: VMEM-resident
            pl.BlockSpec((1, HIDDEN), const),                       # b1
            pl.BlockSpec((HIDDEN, HIDDEN), const),                  # w2
            pl.BlockSpec((1, HIDDEN), const),                       # b2
            pl.BlockSpec((HIDDEN, HEAD_WIDTH), const),              # fused head weight
            pl.BlockSpec((1, HEAD_WIDTH), const),                   # fused head bias
        ],
        out_specs=pl.BlockSpec((tb, HEAD_WIDTH), lambda i: (i, 0)),  # lane-dense output tile
        compiler_params=pltpu.CompilerParams(
            dimension_semantics=("parallel",)),                      # v7x: shard batch over 2 TCs
    )(xp, w1, b1, w2, b2, wh, bh)

    pi = out[:B, :ACTION_SIZE]
    v = out[:B, ACTION_SIZE:ACTION_SIZE + 1]
    return pi, v
    # TODO(synk): for single-env (B~8) inference, batch multiple timesteps per call or use a
    # persistent multi-step kernel — at that size wall clock is pure dispatch/DMA latency.


def init_params(key):
    """PyTorch nn.Linear default init: U(-1/sqrt(fan_in), 1/sqrt(fan_in)).
    Weights stored as [in, out]; biases stored as [1, out]."""
    def linear(key, fan_in, fan_out):
        kw, kb = jax.random.split(key)
        bound = 1.0 / jnp.sqrt(fan_in)
        w = jax.random.uniform(kw, (fan_in, fan_out), jnp.float32, -bound, bound)
        b = jax.random.uniform(kb, (1, fan_out), jnp.float32, -bound, bound)
        return w, b

    k1, k2, k3, k4 = jax.random.split(key, 4)
    w1, b1 = linear(k1, STATE_SIZE, HIDDEN)
    w2, b2 = linear(k2, HIDDEN, HIDDEN)
    wpi, bpi = linear(k3, HIDDEN, ACTION_SIZE)
    wv, bv = linear(k4, HIDDEN, 1)
    return (w1, b1, w2, b2, wpi, bpi, wv, bv)


def reference_forward(x, raw_params):
    w1, b1, w2, b2, wpi, bpi, wv, bv = raw_params
    h1 = jnp.maximum(x @ w1 + b1, 0.0)
    h2 = jnp.maximum(h1 @ w2 + b2, 0.0)
    pi = jax.nn.softmax(h2 @ wpi + bpi, axis=-1)
    v = h2 @ wv + bv
    return pi, v


if __name__ == "__main__":
    key = jax.random.PRNGKey(0)
    kparam, kx = jax.random.split(key)
    raw_params = init_params(kparam)

    batch = 8
    x = jax.random.normal(kx, (batch, STATE_SIZE), jnp.float32)
    pi_ref, v_ref = reference_forward(x, raw_params)

    # --- f32 path: strict check against the reference ---
    params_f32 = prepare_params(raw_params, jnp.float32)
    pi, v = actor_critic_forward(x, params_f32)
    jax.block_until_ready((pi, v))
    assert pi.shape == (batch, ACTION_SIZE) and v.shape == (batch, 1)
    assert jnp.allclose(pi, pi_ref, atol=1e-5, rtol=1e-5)
    assert jnp.allclose(v, v_ref, atol=1e-5, rtol=1e-5)
    assert jnp.allclose(jnp.sum(pi, axis=-1), 1.0, atol=1e-5)

    # --- bf16 operand path (v6e/v7x MXU): relaxed tolerance ---
    params_bf16 = prepare_params(raw_params, jnp.bfloat16)
    pi_b, v_b = actor_critic_forward(x, params_bf16)
    jax.block_until_ready((pi_b, v_b))
    assert pi_b.shape == (batch, ACTION_SIZE) and v_b.shape == (batch, 1)
    assert jnp.allclose(pi_b, pi_ref, atol=5e-2, rtol=5e-2)
    assert jnp.allclose(v_b, v_ref, atol=5e-2, rtol=5e-2)
    assert jnp.allclose(jnp.sum(pi_b, axis=-1), 1.0, atol=1e-5)

    print("KERNEL_OK")
</pallas_src>

<mosaic_0001>
module attributes {stable_mosaic.version = 11 : i64} {
  func.func @actor_critic_kernel(%arg0: i32, %arg1: memref<16x128xf32, #tpu.memory_space<vmem>>, %arg2: memref<128x128xf32, #tpu.memory_space<vmem>>, %arg3: memref<1x128xf32, #tpu.memory_space<vmem>>, %arg4: memref<128x128xf32, #tpu.memory_space<vmem>>, %arg5: memref<1x128xf32, #tpu.memory_space<vmem>>, %arg6: memref<128x128xf32, #tpu.memory_space<vmem>>, %arg7: memref<1x128xf32, #tpu.memory_space<vmem>>, %arg8: memref<16x128xf32, #tpu.memory_space<vmem>>) attributes {dimension_semantics = [#tpu.dimension_semantics<parallel>], iteration_bounds = array<i64: 1>, scalar_prefetch = 0 : i64, scratch_operands = 0 : i64, tpu.core_type = #tpu.core_type<tc>, window_params = [{transform_indices = @transform_0, window_bounds = array<i64: 16, 128>}, {pipeline_mode = #tpu.pipeline_mode<synchronous>, transform_indices = @transform_1, window_bounds = array<i64: 128, 128>}, {pipeline_mode = #tpu.pipeline_mode<synchronous>, transform_indices = @transform_2, window_bounds = array<i64: 1, 128>}, {pipeline_mode = #tpu.pipeline_mode<synchronous>, transform_indices = @transform_3, window_bounds = array<i64: 128, 128>}, {pipeline_mode = #tpu.pipeline_mode<synchronous>, transform_indices = @transform_4, window_bounds = array<i64: 1, 128>}, {pipeline_mode = #tpu.pipeline_mode<synchronous>, transform_indices = @transform_5, window_bounds = array<i64: 128, 128>}, {pipeline_mode = #tpu.pipeline_mode<synchronous>, transform_indices = @transform_6, window_bounds = array<i64: 1, 128>}, {transform_indices = @transform_7, window_bounds = array<i64: 16, 128>}]} {
    %c0 = arith.constant 0 : index
    %c0_0 = arith.constant 0 : index
    %0 = vector.load %arg1[%c0, %c0_0] : memref<16x128xf32, #tpu.memory_space<vmem>>, vector<16x128xf32>
    %c0_1 = arith.constant 0 : index
    %c0_2 = arith.constant 0 : index
    %1 = vector.load %arg2[%c0_1, %c0_2] : memref<128x128xf32, #tpu.memory_space<vmem>>, vector<128x128xf32>
    %cst = arith.constant dense<0.000000e+00> : vector<16x128xf32>
    %2 = tpu.matmul %0, %1, %cst {dimension_numbers = #tpu.dot_dimension_numbers<[1], [0], [0], [1], [0, 0, 1, 1], [], []>} : vector<16x128xf32>, vector<128x128xf32>, vector<16x128xf32> -> vector<16x128xf32>
    %c0_3 = arith.constant 0 : index
    %c0_4 = arith.constant 0 : index
    %3 = vector.load %arg3[%c0_3, %c0_4] : memref<1x128xf32, #tpu.memory_space<vmem>>, vector<1x128xf32>
    %4 = vector.broadcast %3 : vector<1x128xf32> to vector<16x128xf32>
    %5 = arith.addf %2, %4 : vector<16x128xf32>
    %cst_5 = arith.constant 0.000000e+00 : f32
    %6 = vector.broadcast %cst_5 : f32 to vector<16x128xf32>
    %7 = arith.maximumf %5, %6 : vector<16x128xf32>
    %c0_6 = arith.constant 0 : index
    %c0_7 = arith.constant 0 : index
    %8 = vector.load %arg4[%c0_6, %c0_7] : memref<128x128xf32, #tpu.memory_space<vmem>>, vector<128x128xf32>
    %cst_8 = arith.constant dense<0.000000e+00> : vector<16x128xf32>
    %9 = tpu.matmul %7, %8, %cst_8 {dimension_numbers = #tpu.dot_dimension_numbers<[1], [0], [0], [1], [0, 0, 1, 1], [], []>} : vector<16x128xf32>, vector<128x128xf32>, vector<16x128xf32> -> vector<16x128xf32>
    %c0_9 = arith.constant 0 : index
    %c0_10 = arith.constant 0 : index
    %10 = vector.load %arg5[%c0_9, %c0_10] : memref<1x128xf32, #tpu.memory_space<vmem>>, vector<1x128xf32>
    %11 = vector.broadcast %10 : vector<1x128xf32> to vector<16x128xf32>
    %12 = arith.addf %9, %11 : vector<16x128xf32>
    %cst_11 = arith.constant 0.000000e+00 : f32
    %13 = vector.broadcast %cst_11 : f32 to vector<16x128xf32>
    %14 = arith.maximumf %12, %13 : vector<16x128xf32>
    %c0_12 = arith.constant 0 : index
    %c0_13 = arith.constant 0 : index
    %15 = vector.load %arg6[%c0_12, %c0_13] : memref<128x128xf32, #tpu.memory_space<vmem>>, vector<128x128xf32>
    %cst_14 = arith.constant dense<0.000000e+00> : vector<16x128xf32>
    %16 = tpu.matmul %14, %15, %cst_14 {dimension_numbers = #tpu.dot_dimension_numbers<[1], [0], [0], [1], [0, 0, 1, 1], [], []>} : vector<16x128xf32>, vector<128x128xf32>, vector<16x128xf32> -> vector<16x128xf32>
    %c0_15 = arith.constant 0 : index
    %c0_16 = arith.constant 0 : index
    %17 = vector.load %arg7[%c0_15, %c0_16] : memref<1x128xf32, #tpu.memory_space<vmem>>, vector<1x128xf32>
    %18 = vector.broadcast %17 : vector<1x128xf32> to vector<16x128xf32>
    %19 = arith.addf %16, %18 : vector<16x128xf32>
    %20 = tpu.iota {dimensions = array<i32: 1>} : vector<16x128xi32>
    %c3_i32 = arith.constant 3 : i32
    %21 = vector.broadcast %c3_i32 : i32 to vector<16x128xi32>
    %22 = arith.cmpi slt, %20, %21 : vector<16x128xi32>
    %cst_17 = arith.constant -1.000000e+30 : f32
    %23 = vector.broadcast %cst_17 : f32 to vector<16x128xf32>
    %24 = arith.select %22, %19, %23 : vector<16x128xi1>, vector<16x128xf32>
    %cst_18 = arith.constant dense<0xFF800000> : vector<16xf32>
    %25 = vector.multi_reduction <maximumf>, %24, %cst_18 [1] : vector<16x128xf32> to vector<16xf32>
    %26 = vector.shape_cast %25 : vector<16xf32> to vector<16x1xf32>
    %27 = vector.broadcast %26 : vector<16x1xf32> to vector<16x128xf32>
    %28 = arith.subf %24, %27 : vector<16x128xf32>
    %29 = math.exp %28 : vector<16x128xf32>
    %cst_19 = arith.constant 0.000000e+00 : f32
    %30 = vector.broadcast %cst_19 : f32 to vector<16x128xf32>
    %31 = arith.select %22, %29, %30 : vector<16x128xi1>, vector<16x128xf32>
    %cst_20 = arith.constant dense<0.000000e+00> : vector<16xf32>
    %32 = vector.multi_reduction <add>, %31, %cst_20 [1] : vector<16x128xf32> to vector<16xf32>
    %33 = vector.shape_cast %32 : vector<16xf32> to vector<16x1xf32>
    %34 = vector.broadcast %33 : vector<16x1xf32> to vector<16x128xf32>
    %35 = arith.divf %31, %34 : vector<16x128xf32>
    %c3_i32_21 = arith.constant 3 : i32
    %36 = vector.broadcast %c3_i32_21 : i32 to vector<16x128xi32>
    %37 = arith.cmpi eq, %20, %36 : vector<16x128xi32>
    %cst_22 = arith.constant 0.000000e+00 : f32
    %38 = vector.broadcast %cst_22 : f32 to vector<16x128xf32>
    %39 = arith.select %37, %19, %38 : vector<16x128xi1>, vector<16x128xf32>
    %40 = arith.select %22, %35, %39 : vector<16x128xi1>, vector<16x128xf32>
    %c0_23 = arith.constant 0 : index
    %c0_24 = arith.constant 0 : index
    %41 = vector.load %arg8[%c0_23, %c0_24] : memref<16x128xf32, #tpu.memory_space<vmem>>, vector<16x128xf32>
    tpu.vector_store %arg8[%c0_23, %c0_24], %40 {strides = array<i32>} : memref<16x128xf32, #tpu.memory_space<vmem>>, vector<16x128xf32>,
    return
  }
  func.func @transform_0(%arg0: i32) -> (i32, i32) {
    %c0_i32 = arith.constant 0 : i32
    %c0_i32_0 = arith.constant 0 : i32
    return %arg0, %c0_i32 : i32, i32
  }
  func.func @transform_1(%arg0: i32) -> (i32, i32) {
    %c0_i32 = arith.constant 0 : i32
    %c0_i32_0 = arith.constant 0 : i32
    %c0_i32_1 = arith.constant 0 : i32
    return %c0_i32, %c0_i32_0 : i32, i32
  }
  func.func @transform_2(%arg0: i32) -> (i32, i32) {
    %c0_i32 = arith.constant 0 : i32
    %c0_i32_0 = arith.constant 0 : i32
    %c0_i32_1 = arith.constant 0 : i32
    return %c0_i32, %c0_i32_0 : i32, i32
  }
  func.func @transform_3(%arg0: i32) -> (i32, i32) {
    %c0_i32 = arith.constant 0 : i32
    %c0_i32_0 = arith.constant 0 : i32
    %c0_i32_1 = arith.constant 0 : i32
    return %c0_i32, %c0_i32_0 : i32, i32
  }
  func.func @transform_4(%arg0: i32) -> (i32, i32) {
    %c0_i32 = arith.constant 0 : i32
    %c0_i32_0 = arith.constant 0 : i32
    %c0_i32_1 = arith.constant 0 : i32
    return %c0_i32, %c0_i32_0 : i32, i32
  }
  func.func @transform_5(%arg0: i32) -> (i32, i32) {
    %c0_i32 = arith.constant 0 : i32
    %c0_i32_0 = arith.constant 0 : i32
    %c0_i32_1 = arith.constant 0 : i32
    return %c0_i32, %c0_i32_0 : i32, i32
  }
  func.func @transform_6(%arg0: i32) -> (i32, i32) {
    %c0_i32 = arith.constant 0 : i32
    %c0_i32_0 = arith.constant 0 : i32
    %c0_i32_1 = arith.constant 0 : i32
    return %c0_i32, %c0_i32_0 : i32, i32
  }
  func.func @transform_7(%arg0: i32) -> (i32, i32) {
    %c0_i32 = arith.constant 0 : i32
    %c0_i32_0 = arith.constant 0 : i32
    return %arg0, %c0_i32 : i32, i32
  }
}

</mosaic_0001>

<bundles_post_ra>
// kernel: tpu_custom_call.1
= control target key start
LH: loop header
LB: loop body
LE: loop exit
PB: predicated region body
PF: predicated region fallthrough
CT: control target
= control target key end

     0   :  { %12 = vsyncpa [#allocation3], 0  ;;  %s975_s0 = inlined_call_operand.hbm [shape: f32[16,128], index: 0, kind: input, shape index: {}]   ;;  %s976_s1 = inlined_call_operand.hbm [shape: f32[128,128], index: 1, kind: input, shape index: {}]   ;;  %s977_s2 = inlined_call_operand.vmem [shape: f32[1,128], index: 2, kind: input, shape index: {}]   ;;  %s978_s3 = inlined_call_operand.hbm [shape: f32[128,128], index: 3, kind: input, shape index: {}]   ;;  %s979_s4 = inlined_call_operand.vmem [shape: f32[1,128], index: 4, kind: input, shape index: {}]   ;;  %s980_s5 = inlined_call_operand.hbm [shape: f32[128,128], index: 5, kind: input, shape index: {}]   ;;  %s981_s6 = inlined_call_operand.vmem [shape: f32[1,128], index: 6, kind: input, shape index: {}]   ;;  %s982_s7 = inlined_call_operand.hbm [shape: f32[16,128], index: 7, kind: output, shape index: {}]  }
   0x1   :  { %13 = vsyncpa [#allocation6], 0 }
   0x2   :  { %14 = vsyncpa [#allocation9], 0 }
   0x3   :  { %15 = vsyncpa [#allocation4], 0  ;;  %s824_s24 = smov [#allocation5]   ;;  %s825_s26 = smov [#allocation2]  }
   0x4   :  { %s33_s25 = sshll.u32 %s824_s24, 4  ;;  %s21_s27 = sshll.u32 %s825_s26, 4  ;;  %s34_s25 = int_to_ptr.vmem [resolvable:$true] %s33_s25  ;;  %s871_s27 = int_to_ptr.vmem [resolvable:$true] %s21_s27 }
   0x5   :  { %s706_s30 = scalar_lea.hbm %s976_s1, 2048 }
   0x6   :  { %p707_p0 = scmp.ne.s32.totalorder %s976_s1, %s706_s30  ;;  %p710_p1 = scmp.lt.u32.totalorder %s706_s30, %s976_s1 }
   0x8   :  { %p712_p2 = pnand %p710_p1, %p707_p0 }
   0xa   :  { %715 = shalt.err (!%p712_p2)
}
   0xb   :  { %s716_s12 = scalar_lea.vmem %s34_s25, 2048  ;;  %p721_p4 = scmp.lt.s32.totalorder %s34_s25, %s34_s25 }
   0xc   :  { %p717_p3 = scmp.ne.s32.totalorder %s34_s25, %s716_s12  ;;  %p722_p5 = scmp.lt.s32.totalorder %s716_s12, %s716_s12 }
   0xe   :  { %p723_p6 = por %p722_p5, %p721_p4 }
  0x10   :  { %p724_p7 = pnand %p723_p6, %p717_p3 }
  0x12   :  { %727 = shalt.err (!%p724_p7)
}
  0x13   :  { %s826_s13 = smov 128   ;;  %s827_s14 = smov 8  }
  0x14   :  { %39 = dma.hbm_to_vmem [thread:$0]  %s976_s1, 2048, %s34_s25, [#allocation6], %s826_s13, %s826_s13, %s827_s14  }
  0x15   :  { %s728_s19 = scalar_lea.hbm %s975_s0, 256 }
  0x16   :  { %p729_p8 = scmp.ne.s32.totalorder %s975_s0, %s728_s19  ;;  %p732_p9 = scmp.lt.u32.totalorder %s728_s19, %s975_s0 }
  0x18   :  { %p734_p10 = pnand %p732_p9, %p729_p8 }
  0x1a   :  { %737 = shalt.err (!%p734_p10)
}
  0x1b   :  { %s738_s24 = scalar_lea.vmem %s871_s27, 256  ;;  %p743_p12 = scmp.lt.s32.totalorder %s871_s27, %s871_s27 }
  0x1c   :  { %p739_p11 = scmp.ne.s32.totalorder %s871_s27, %s738_s24  ;;  %p744_p13 = scmp.lt.s32.totalorder %s738_s24, %s738_s24 }
  0x1e   :  { %p745_p0 = por %p744_p13, %p743_p12 }
  0x20   :  { %p746_p1 = pnand %p745_p0, %p739_p11 }
  0x22   :  { %749 = shalt.err (!%p746_p1)
}
  0x23   :  { %27 = dma.hbm_to_vmem [thread:$0]  %s975_s0, 256, %s871_s27, [#allocation3], %s826_s13, %s826_s13, %s827_s14  }
  0x24   :  { %s828_s26 = smov [#allocation7]   ;;  %s829_s29 = smov [#allocation8]  }
  0x25   :  { %s47_s28 = sshll.u32 %s828_s26, 4  ;;  %s61_s30 = sshll.u32 %s829_s29, 4  ;;  %s48_s28 = int_to_ptr.vmem [resolvable:$true] %s47_s28  ;;  %s908_s30 = int_to_ptr.vmem [resolvable:$true] %s61_s30 }
  0x26   :  { %s750_s10 = scalar_lea.hbm %s978_s3, 2048 }
  0x27   :  { %p751_p2 = scmp.ne.s32.totalorder %s978_s3, %s750_s10  ;;  %p754_p3 = scmp.lt.u32.totalorder %s750_s10, %s978_s3 }
  0x29   :  { %p756_p4 = pnand %p754_p3, %p751_p2 }
  0x2b   :  { %759 = shalt.err (!%p756_p4)
}
  0x2c   :  { %s760_s0 = scalar_lea.vmem %s48_s28, 2048  ;;  %p765_p6 = scmp.lt.s32.totalorder %s48_s28, %s48_s28 }
  0x2d   :  { %p761_p5 = scmp.ne.s32.totalorder %s48_s28, %s760_s0  ;;  %p766_p7 = scmp.lt.s32.totalorder %s760_s0, %s760_s0 }
  0x2f   :  { %p767_p8 = por %p766_p7, %p765_p6 }
  0x31   :  { %p768_p9 = pnand %p767_p8, %p761_p5 }
  0x33   :  { %771 = shalt.err (!%p768_p9)
}
  0x34   :  { %53 = dma.hbm_to_vmem [thread:$0]  %s978_s3, 2048, %s48_s28, [#allocation6], %s826_s13, %s826_s13, %s827_s14  }
  0x35   :  { %s772_s20 = scalar_lea.hbm %s980_s5, 2048 }
  0x36   :  { %p773_p10 = scmp.ne.s32.totalorder %s980_s5, %s772_s20  ;;  %p776_p11 = scmp.lt.u32.totalorder %s772_s20, %s980_s5 }
  0x38   :  { %p778_p12 = pnand %p776_p11, %p773_p10 }
  0x3a   :  { %781 = shalt.err (!%p778_p12)
}
  0x3b   :  { %s782_s1 = scalar_lea.vmem %s908_s30, 2048  ;;  %p787_p0 = scmp.lt.s32.totalorder %s908_s30, %s908_s30 }
  0x3c   :  { %p783_p13 = scmp.ne.s32.totalorder %s908_s30, %s782_s1  ;;  %p788_p1 = scmp.lt.s32.totalorder %s782_s1, %s782_s1 }
  0x3e   :  { %p789_p2 = por %p788_p1, %p787_p0 }
  0x40   :  { %p790_p3 = pnand %p789_p2, %p783_p13 }
  0x42   :  { %793 = shalt.err (!%p790_p3)
}
  0x43   :  { %67 = dma.hbm_to_vmem [thread:$0]  %s980_s5, 2048, %s908_s30, [#allocation9], %s826_s13, %s826_s13, %s827_s14  }
  0x44   :  { %816 = dma.done.wait [#allocation3], 256  }
  0x45   :  { %817 = vsyncadd [#allocation3], 4294967040 }
  0x46   :  { %818 = dma.done.wait [#allocation6], 4096  }
  0x47   :  { %819 = vsyncadd [#allocation6], 4294963200 }
  0x48   :  { %820 = dma.done.wait [#allocation9], 2048  }
  0x49   :  { %821 = vsyncadd [#allocation9], 4294965248  ;;  %v84_v0 = vld [vmem:[#allocation5] sm:$0xff]  ;;  %v85_v1 = vld [vmem:[#allocation5 + $0x8] sm:$0xff] }
  0x4a   :  { %v86_v2 = vld [vmem:[#allocation5 + $0x10] sm:$0xff]  ;;  %v595_v3 = vpack.c.bf16 %v85_v1, %v84_v0  ;;  %v87_v4 = vld [vmem:[#allocation5 + $0x18] sm:$0xff]  ;;  %v88_v6 = vld [vmem:[#allocation5 + $0x20] sm:$0xff] }
  0x4b   :  { %v599_v5 = vpack.c.bf16 %v87_v4, %v86_v2  ;;  %v89_v7 = vld [vmem:[#allocation5 + $0x28] sm:$0xff]  ;;  %v90_v9 = vld [vmem:[#allocation5 + $0x30] sm:$0xff]  ;;  %v91_v10 = vld [vmem:[#allocation5 + $0x38] sm:$0xff] }
  0x4c   :  { %596 = vmatprep.subr.bf16.mxu0 %v595_v3  ;;  %v603_v8 = vpack.c.bf16 %v89_v7, %v88_v6  ;;  %v82_v11 = vld [vmem:[#allocation2] sm:$0xff]  ;;  %v184_v12 = vld [vmem:[#allocation7] sm:$0xff]  ;;  %v185_v13 = vld [vmem:[#allocation7 + $0x8] sm:$0xff]  ;;  %v607_v20 = vpack.c.bf16 %v91_v10, %v90_v9 }
  0x4d   :  { %598 = vmatpush3.bf16.msra.mxu0 %v595_v3  ;;  %522 = vmatprep.mubr.f32.mxu0 %v82_v11  ;;  %v186_v14 = vld [vmem:[#allocation7 + $0x10] sm:$0xff]  ;;  %v627_v15 = vpack.c.bf16 %v185_v13, %v184_v12  ;;  %v187_v16 = vld [vmem:[#allocation7 + $0x18] sm:$0xff]  ;;  %v188_v18 = vld [vmem:[#allocation7 + $0x20] sm:$0xff] }
  0x4e   :  { %600 = vmatprep.subr.bf16.mxu0 %v599_v5  ;;  %v631_v17 = vpack.c.bf16 %v187_v16, %v186_v14  ;;  %v189_v19 = vld [vmem:[#allocation7 + $0x28] sm:$0xff]  ;;  %v92_v21 = vld [vmem:[#allocation5 + $0x40] sm:$0xff]  ;;  %v190_v24 = vld [vmem:[#allocation7 + $0x30] sm:$0xff] }
  0x4f   :  { %628 = vmatprep.subr.bf16.mxu1 %v627_v15  ;;  %v93_v22 = vld [vmem:[#allocation5 + $0x48] sm:$0xff]  ;;  %v635_v23 = vpack.c.bf16 %v189_v19, %v188_v18  ;;  %v191_v25 = vld [vmem:[#allocation7 + $0x38] sm:$0xff]  ;;  %v94_v27 = vld [vmem:[#allocation5 + $0x50] sm:$0xff] }
  0x50   :  { %630 = vmatpush3.bf16.msra.mxu1 %v627_v15  ;;  %v611_v26 = vpack.c.bf16 %v93_v22, %v92_v21  ;;  %v95_v28 = vld [vmem:[#allocation5 + $0x58] sm:$0xff]  ;;  %v639_v29 = vpack.c.bf16 %v191_v25, %v190_v24  ;;  %v192_v30 = vld [vmem:[#allocation7 + $0x40] sm:$0xff]  ;;  %v193_v31 = vld [vmem:[#allocation7 + $0x48] sm:$0xff]  ;;  %v382_v24 = vlaneseq }
  0x51   :  { %602 = vmatpush3.bf16.msra.mxu0 %v599_v5  ;;  %632 = vmatprep.subr.bf16.mxu1 %v631_v17  ;;  %v615_v32 = vpack.c.bf16 %v95_v28, %v94_v27  ;;  %v96_v33 = vld [vmem:[#allocation5 + $0x60] sm:$0xff]  ;;  %v97_v34 = vld [vmem:[#allocation5 + $0x68] sm:$0xff]  ;;  %v643_v35 = vpack.c.bf16 %v193_v31, %v192_v30  ;;  %v194_v36 = vld [vmem:[#allocation7 + $0x50] sm:$0xff] }
  0x52   :  { %604 = vmatprep.subr.bf16.mxu0 %v603_v8  ;;  %v195_v37 = vld [vmem:[#allocation7 + $0x58] sm:$0xff]  ;;  %v619_v38 = vpack.c.bf16 %v97_v34, %v96_v33  ;;  %v98_v39 = vld [vmem:[#allocation5 + $0x70] sm:$0xff]  ;;  %v196_v42 = vld [vmem:[#allocation7 + $0x60] sm:$0xff]  ;;  %v383_v25 = vand.u32 127, %v382_v24 }
  0x53   :  { %v99_v40 = vld [vmem:[#allocation5 + $0x78] sm:$0xff]  ;;  %v647_v41 = vpack.c.bf16 %v195_v37, %v194_v36  ;;  %v197_v43 = vld [vmem:[#allocation7 + $0x68] sm:$0xff]  ;;  %v198_v47 = vld [vmem:[#allocation7 + $0x70] sm:$0xff] }
  0x54   :  { %634 = vmatpush3.bf16.msra.mxu1 %v631_v17  ;;  %v623_v44 = vpack.c.bf16 %v99_v40, %v98_v39  ;;  %v651_v45 = vpack.c.bf16 %v197_v43, %v196_v42  ;;  %v83_v46 = vld [vmem:[#allocation2 + $0x8] sm:$0xff]  ;;  %v284_v50 = vld [vmem:[#allocation8] sm:$0xff]  ;;  %v285_v51 = vld [vmem:[#allocation8 + $0x8] sm:$0xff]  ;;  %vm407_vm0 = vcmp.eq.s32.totalorder %v383_v25, 3  ;;  %vm384_vm1 = vcmp.lt.s32.totalorder %v383_v25, 3 }
  0x55   :  { %606 = vmatpush3.bf16.msra.mxu0 %v603_v8  ;;  %636 = vmatprep.subr.bf16.mxu1 %v635_v23  ;;  %v199_v48 = vld [vmem:[#allocation7 + $0x78] sm:$0xff]  ;;  %v286_v52 = vld [vmem:[#allocation8 + $0x10] sm:$0xff]  ;;  %v659_v53 = vpack.c.bf16 %v285_v51, %v284_v50  ;;  %v288_v56 = vld [vmem:[#allocation8 + $0x20] sm:$0xff] }
  0x56   :  { %608 = vmatprep.subr.bf16.mxu0 %v607_v20  ;;  %v655_v49 = vpack.c.bf16 %v199_v48, %v198_v47  ;;  %v287_v54 = vld [vmem:[#allocation8 + $0x18] sm:$0xff]  ;;  %v289_v57 = vld [vmem:[#allocation8 + $0x28] sm:$0xff]  ;;  %v290_v59 = vld [vmem:[#allocation8 + $0x30] sm:$0xff] }
  0x57   :  { %v663_v55 = vpack.c.bf16 %v287_v54, %v286_v52  ;;  %v667_v58 = vpack.c.bf16 %v289_v57, %v288_v56  ;;  %v291_v60 = vld [vmem:[#allocation8 + $0x38] sm:$0xff]  ;;  %v292_v62 = vld [vmem:[#allocation8 + $0x40] sm:$0xff]  ;;  %v293_v63 = vld [vmem:[#allocation8 + $0x48] sm:$0xff] }
  0x58   :  { %638 = vmatpush3.bf16.msra.mxu1 %v635_v23  ;;  %v671_v61 = vpack.c.bf16 %v291_v60, %v290_v59  ;;  %v675_v0 = vpack.c.bf16 %v293_v63, %v292_v62  ;;  %v294_v1 = vld [vmem:[#allocation8 + $0x50] sm:$0xff]  ;;  %v295_v2 = vld [vmem:[#allocation8 + $0x58] sm:$0xff]  ;;  %v296_v4 = vld [vmem:[#allocation8 + $0x60] sm:$0xff] }
  0x59   :  { %610 = vmatpush3.bf16.msra.mxu0 %v607_v20  ;;  %640 = vmatprep.subr.bf16.mxu1 %v639_v29  ;;  %v679_v3 = vpack.c.bf16 %v295_v2, %v294_v1  ;;  %v297_v5 = vld [vmem:[#allocation8 + $0x68] sm:$0xff]  ;;  %v433_v7 = vld [vmem:[%s977_s2] ss:$0 sm:$0xff]  ;;  %v299_v15 = vld [vmem:[#allocation8 + $0x78] sm:$0xff] }
  0x5a   :  { %612 = vmatprep.subr.bf16.mxu0 %v611_v26  ;;  %v683_v6 = vpack.c.bf16 %v297_v5, %v296_v4  ;;  %v298_v14 = vld [vmem:[#allocation8 + $0x70] sm:$0xff] }
  0x5b   :  { %v687_v16 = vpack.c.bf16 %v299_v15, %v298_v14  ;;  %v434_v17 = vld [vmem:[%s979_s4] ss:$0 sm:$0xff]  ;;  %s830_s4 = smov [#allocation10]  }
  0x5c   :  { %642 = vmatpush3.bf16.msra.mxu1 %v639_v29 }
  0x5d   :  { %614 = vmatpush3.bf16.msra.mxu0 %v611_v26  ;;  %644 = vmatprep.subr.bf16.mxu1 %v643_v35  ;;  %v435_v26 = vld [vmem:[%s981_s6] ss:$0 sm:$0xff]  ;;  %s419_s6 = sshll.u32 %s830_s4, 4  ;;  %s420_s6 = int_to_ptr.vmem [resolvable:$true] %s419_s6 }
  0x5e   :  { %616 = vmatprep.subr.bf16.mxu0 %v615_v32  ;;  %s794_s8 = scalar_lea.vmem %s420_s6, 256  ;;  %p799_p5 = scmp.lt.s32.totalorder %s420_s6, %s420_s6 }
  0x5f   :  { %p795_p4 = scmp.ne.s32.totalorder %s420_s6, %s794_s8  ;;  %p800_p6 = scmp.lt.s32.totalorder %s794_s8, %s794_s8 }
  0x60   :  { %646 = vmatpush3.bf16.msra.mxu1 %v643_v35 }
  0x61   :  { %618 = vmatpush3.bf16.msra.mxu0 %v615_v32  ;;  %648 = vmatprep.subr.bf16.mxu1 %v647_v41  ;;  %p801_p7 = por %p800_p6, %p799_p5 }
  0x62   :  { %620 = vmatprep.subr.bf16.mxu0 %v619_v38 }
  0x63   :  { %p802_p8 = pnand %p801_p7, %p795_p4 }
  0x64   :  { %650 = vmatpush3.bf16.msra.mxu1 %v647_v41 }
  0x65   :  { %622 = vmatpush3.bf16.msra.mxu0 %v619_v38  ;;  %652 = vmatprep.subr.bf16.mxu1 %v651_v45 }
  0x66   :  { %624 = vmatprep.subr.bf16.mxu0 %v623_v44 }
  0x68   :  { %654 = vmatpush3.bf16.msra.mxu1 %v651_v45 }
  0x69   :  { %626 = vmatpush3.bf16.msra.mxu0 %v623_v44  ;;  %656 = vmatprep.subr.bf16.mxu1 %v655_v49 }
  0x6a   :  { %660 = vmatprep.subr.bf16.mxu0 %v659_v53 }
  0x6c   :  { %523 = vmatmul.mubr.f32.vlgmr.msra.gmra.mrb[0].mxu0 %v83_v46  ;;  %658 = vmatpush3.bf16.msra.mxu1 %v655_v49 }
  0x6d   :  { %662 = vmatpush3.bf16.msra.mxu0 %v659_v53 }
  0x6e   :  { %664 = vmatprep.subr.bf16.mxu0 %v663_v55 }
  0x71   :  { %666 = vmatpush3.bf16.msra.mxu0 %v663_v55 }
  0x72   :  { %668 = vmatprep.subr.bf16.mxu0 %v667_v58 }
  0x75   :  { %670 = vmatpush3.bf16.msra.mxu0 %v667_v58 }
  0x76   :  { %672 = vmatprep.subr.bf16.mxu0 %v671_v61 }
  0x79   :  { %674 = vmatpush3.bf16.msra.mxu0 %v671_v61 }
  0x7a   :  { %676 = vmatprep.subr.bf16.mxu0 %v675_v0 }
  0x7d   :  { %678 = vmatpush3.bf16.msra.mxu0 %v675_v0 }
  0x7e   :  { %680 = vmatprep.subr.bf16.mxu0 %v679_v3 }
  0x81   :  { %682 = vmatpush3.bf16.msra.mxu0 %v679_v3 }
  0x82   :  { %684 = vmatprep.subr.bf16.mxu0 %v683_v6 }
  0x85   :  { %686 = vmatpush3.bf16.msra.mxu0 %v683_v6 }
  0x86   :  { %688 = vmatprep.subr.bf16.mxu0 %v687_v16 }
  0x89   :  { %690 = vmatpush3.bf16.msra.mxu0 %v687_v16 }
 0x13f   :  { %v524_v8 = vpop.f32.mrb[0].mxu0 }
 0x140   :  { %v179_v9 = vadd.f32 %v524_v8, %v433_v7  ;;  %v173_v10 = vpop.f32.mrb[1].mxu0 }
 0x141   :  { %v174_v11 = vadd.f32 %v433_v7, %v173_v10 }
 0x142   :  { %v183_v13 = vmax.f32 %v179_v9, 0.0 }
 0x143   :  { %v182_v12 = vmax.f32 %v174_v11, 0.0 }
 0x145   :  { %557 = vmatprep.mubr.f32.mxu1 %v182_v12 }
 0x146   :  { %558 = vmatmul.mubr.f32.vlgmr.msra.gmra.mrb[0].mxu1 %v183_v13 }
 0x219   :  { %v559_v18 = vpop.f32.mrb[0].mxu1 }
 0x21a   :  { %v279_v19 = vadd.f32 %v559_v18, %v434_v17  ;;  %v273_v20 = vpop.f32.mrb[1].mxu1 }
 0x21b   :  { %v274_v21 = vadd.f32 %v434_v17, %v273_v20 }
 0x21c   :  { %v283_v23 = vmax.f32 %v279_v19, 0.0 }
 0x21d   :  { %v282_v22 = vmax.f32 %v274_v21, 0.0 }
 0x21f   :  { %592 = vmatprep.mubr.f32.mxu0 %v282_v22 }
 0x220   :  { %593 = vmatmul.mubr.f32.vlgmr.msra.gmra.mrb[2].mxu0 %v283_v23 }
 0x2f3   :  { %v594_v27 = vpop.f32.mrb[2].mxu0 }
 0x2f4   :  { %v379_v28 = vadd.f32 %v594_v27, %v435_v26  ;;  %v373_v29 = vpop.f32.mrb[3].mxu0 }
 0x2f5   :  { %v374_v30 = vadd.f32 %v435_v26, %v373_v29 }
 0x2f6   :  { %v409_v31 = vsel %vm407_vm0, %v379_v28, 0.0  ;;  %v386_v34 = vsel %vm384_vm1, %v379_v28, -1e+30 }
 0x2f7   :  { %v408_v32 = vsel %vm407_vm0, %v374_v30, 0.0  ;;  %v385_v33 = vsel %vm384_vm1, %v374_v30, -1e+30 }
 0x2f8   :  { %387 = vmax.xlane.f32.xlu0 %v385_v33 }
 0x2fc   :  { %389 = vmax.xlane.f32.xlu0 %v386_v34 }
 0x385   :  { %v388_v35 = vpop.xlane.xlu0 %387 }
 0x386   :  { %v391_v36 = vsub.f32 %v385_v33, %v388_v35 }
 0x388   :  { %v393_v37 = vmul.f32 1.442695, %v391_v36 }
 0x389   :  { %v390_v38 = vpop.xlane.xlu0 %389 }
 0x38a   :  { %698 = vpow2.f32 %v393_v37  ;;  %v392_v39 = vsub.f32 %v386_v34, %v390_v38 }
 0x38c   :  { %v395_v40 = vmul.f32 1.442695, %v392_v39 }
 0x38e   :  { %700 = vpow2.f32 %v395_v40 }
 0x394   :  { %v699_v41 = vpop.eup %698 }
 0x395   :  { %v397_v42 = vsel %vm384_vm1, %v699_v41, 0.0 }
 0x396   :  { %399 = vadd.xlane.f32.xlu1 %v397_v42 }
 0x398   :  { %v701_v43 = vpop.eup %700 }
 0x399   :  { %v398_v44 = vsel %vm384_vm1, %v701_v43, 0.0 }
 0x39a   :  { %401 = vadd.xlane.f32.xlu1 %v398_v44 }
 0x423   :  { %v400_v45 = vpop.xlane.xlu1 %399 }
 0x424   :  { %702 = vrcp.f32 %v400_v45 }
 0x427   :  { %v402_v46 = vpop.xlane.xlu1 %401 }
 0x428   :  { %704 = vrcp.f32 %v402_v46 }
 0x42e   :  { %v703_v47 = vpop.eup %702 }
 0x42f   :  { %v404_v48 = vmul.f32 %v703_v47, %v397_v42 }
 0x431   :  { %v410_v49 = vsel %vm384_vm1, %v404_v48, %v408_v32 }
 0x432   :  { %v705_v50 = vpop.eup %704  ;;  %412 = vst [vmem:[#allocation10] sm:$0xff] %v410_v49 }
 0x433   :  { %v406_v51 = vmul.f32 %v705_v50, %v398_v44 }
 0x435   :  { %v411_v52 = vsel %vm384_vm1, %v406_v51, %v409_v31 }
 0x436   :  { %413 = vst [vmem:[#allocation10 + $0x8] sm:$0xff] %v411_v52 }
 0x437   :  { %805 = shalt.err (!%p802_p8)
}
 0x438   :  { %s806_s11 = scalar_lea.hbm %s982_s7, 256 }
 0x439   :  { %p807_p9 = scmp.ne.s32.totalorder %s982_s7, %s806_s11  ;;  %p810_p10 = scmp.lt.u32.totalorder %s806_s11, %s982_s7 }
 0x43b   :  { %p812_p11 = pnand %p810_p10, %p807_p9 }
 0x43d   :  { %815 = shalt.err (!%p812_p11)
}
 0x43e   :  { %425 = dma.vmem_to_hbm [thread:$0]  %s420_s6, 256, %s982_s7, [#allocation4], %s826_s13, %s826_s13, %s827_s14  }
 0x43f   :  { %822 = dma.done.wait [#allocation4], 256  }
 0x440   :  { %823 = vsyncadd [#allocation4], 4294967040 }
 0x441   :  { %429 = vsyncpa [#allocation3], 1 }
 0x442   :  { %430 = vsyncpa [#allocation6], 1 }
 0x443   :  { %431 = vsyncpa [#allocation9], 1 }
 0x444   :  { %432 = vsyncpa [#allocation4], 1 }

</bundles_post_ra>
